<compile_context>
chip_gen: v6e
topology: v6e:2x2x1
jax: 0.10.0
libtpu: 0.0.40
codegen_flags: <defaults>
</compile_context>

<pallas_src>
import functools

import jax
import jax.numpy as jnp
from jax.experimental import pallas as pl
from jax.experimental.pallas import tpu as pltpu


def _round_up(v, m):
    return (v + m - 1) // m * m


def graph_aggregator_kernel(x_ref, batch_ref, wcat_ref, bcat_ref, wf_ref, bf_ref,
                            out_ref, acc_ref, cnt_ref):
    i = pl.program_id(0)
    b_pad, g_pad = acc_ref.shape

    @pl.when(i == 0)
    def _init():
        acc_ref[...] = jnp.zeros_like(acc_ref)
        cnt_ref[...] = jnp.zeros_like(cnt_ref)

    x = x_ref[...]                                                     # bf16 [T, D_pad]

    # --- fused state+gate projection: single MXU pass over the x tile ---------
    proj = jnp.dot(x, wcat_ref[...],
                   preferred_element_type=jnp.float32) + bcat_ref[...]  # f32 [T, 2*G_pad]
    states = proj[:, :g_pad]                                            # f32 [T, G_pad]
    logits = proj[:, g_pad:]                                            # f32 [T, G_pad]

    # --- softmax over features (padded gate cols carry bias -1e9 -> exp == 0) -
    m = jnp.max(logits, axis=-1, keepdims=True)
    e = jnp.exp(logits - m)
    gates = e * pl.reciprocal(jnp.sum(e, axis=-1, keepdims=True), approx=True)
    gated = (states * gates).astype(jnp.bfloat16)                       # bf16 [T, G_pad]

    # --- per-tile one-hot segment matmul (scatter_mean numerator) -------------
    tile_n = gated.shape[0]
    graph_ids = jax.lax.broadcasted_iota(jnp.int32, (b_pad, tile_n), 0)  # [B_pad, T]
    one_hot = (graph_ids == batch_ref[...]).astype(jnp.bfloat16)         # padded rows: id=-1 -> 0
    acc_ref[...] += jnp.dot(one_hot, gated, preferred_element_type=jnp.float32)
    # Counts are logically [B_pad, 1]; accumulate into a narrow (B_pad, 128)
    # scratch via an XLU lane-reduce instead of touching G_pad lanes per tile.
    cnt_ref[...] += jnp.sum(one_hot.astype(jnp.float32), axis=-1, keepdims=True)

    # --- epilogue: mean + final linear, executed once --------------------------
    @pl.when(i == pl.num_programs(0) - 1)
    def _finalize():
        counts = cnt_ref[...][:, 0:1]                                    # [B_pad, 1]
        mean = acc_ref[...] / jnp.maximum(counts, 1.0)                   # empty graph -> 0
        out = jnp.dot(mean.astype(jnp.bfloat16), wf_ref[...],
                      preferred_element_type=jnp.float32) + bf_ref[...]
        out_ref[...] = out.astype(out_ref.dtype)


@functools.partial(jax.jit, static_argnames=("num_graphs", "tile_n"))
def graph_aggregator(x, batch, w, b, wg, bg, wf, bf, num_graphs, *, tile_n=1024):
    n, d = x.shape
    g = w.shape[1]
    assert tile_n % 128 == 0, "tile_n must be a multiple of 128"

    d_pad = _round_up(d, 128)
    g_pad = _round_up(g, 128)
    b_pad = _round_up(max(num_graphs, 1), 8)
    n_pad = _round_up(n, tile_n)
    n_tiles = n_pad // tile_n

    # --- pad & cast operands (bf16 MXU operands, f32 biases) -------------------
    xp = jnp.pad(x, ((0, n_pad - n), (0, d_pad - d))).astype(jnp.bfloat16)
    batchp = jnp.pad(batch.astype(jnp.int32), (0, n_pad - n),
                     constant_values=-1).reshape(1, n_pad)              # -1 never matches
    wp = jnp.pad(w, ((0, d_pad - d), (0, g_pad - g))).astype(jnp.bfloat16)
    wgp = jnp.pad(wg, ((0, d_pad - d), (0, g_pad - g))).astype(jnp.bfloat16)
    wfp = jnp.pad(wf, ((0, g_pad - g), (0, g_pad - g))).astype(jnp.bfloat16)
    bp = jnp.pad(b, (0, g_pad - g)).astype(jnp.float32)
    bgp = jnp.pad(bg, (0, g_pad - g), constant_values=-1e9).astype(jnp.float32)
    bfp = jnp.pad(bf, (0, g_pad - g)).reshape(1, g_pad).astype(jnp.float32)

    # Fused [states | gate_logits] projection operands.
    wcat = jnp.concatenate([wp, wgp], axis=1)                            # [D_pad, 2*G_pad] bf16
    bcat = jnp.concatenate([bp, bgp], axis=0).reshape(1, 2 * g_pad)      # [1, 2*G_pad]  f32

    cost = pl.CostEstimate(
        flops=int(4 * n_pad * d_pad * g_pad            # fused projection (2*G_pad cols)
                  + 2 * n_pad * b_pad * g_pad          # segment matmul
                  + 2 * b_pad * g_pad * g_pad),        # final linear
        transcendentals=int(n_pad * g_pad + n_pad),
        bytes_accessed=int(n_pad * d_pad * 2 + n_pad * 4
                           + d_pad * 2 * g_pad * 2 + 2 * g_pad * 4
                           + g_pad * g_pad * 2 + g_pad * 4
                           + b_pad * g_pad * 4),
    )

    # Footprint-derived scoped-VMEM budget (generation-aware: stays inside v7x's
    # 64 MiB physical while letting big tiles through on v5e/v6e).
    vmem_bytes = (
        2 * tile_n * d_pad * 2            # x tiles, double-buffered bf16
        + 2 * 8 * tile_n * 4              # batch tiles, double-buffered int32 (sublane padded)
        + d_pad * 2 * g_pad * 2           # fused weight, single buffer
        + 2 * g_pad * 4                   # fused bias
        + g_pad * g_pad * 2 + g_pad * 4   # wf, bf (single buffer)
        + b_pad * g_pad * 4               # segment-sum accumulator
        + b_pad * 128 * 4                 # counts scratch
        + 2 * b_pad * g_pad * 4           # output, double-buffered
        + 4 * tile_n * 2 * g_pad * 4      # headroom for in-flight f32 temporaries
    )
    vmem_limit = int(min(max(vmem_bytes * 3 // 2, 16 * 1024 * 1024), 64 * 1024 * 1024))

    out = pl.pallas_call(
        graph_aggregator_kernel,
        # Output in the caller's dtype (f32 here) — halves writeback if caller is bf16.
        out_shape=jax.ShapeDtypeStruct((b_pad, g_pad), x.dtype),
        grid_spec=pltpu.PrefetchScalarGridSpec(
            num_scalar_prefetch=0,
            grid=(n_tiles,),
            in_specs=[
                # Streamed operands: default double-buffering overlaps DMA/compute.
                pl.BlockSpec((tile_n, d_pad), lambda i: (i, 0)),                 # x tile
                pl.BlockSpec((1, tile_n), lambda i: (0, i)),                     # batch tile
                # Grid-invariant operands: single-buffer (no wasted 2x VMEM).
                pl.BlockSpec((d_pad, 2 * g_pad), lambda i: (0, 0),
                             pipeline_mode=pl.Buffered(1)),                      # w|wg fused
                pl.BlockSpec((1, 2 * g_pad), lambda i: (0, 0),
                             pipeline_mode=pl.Buffered(1)),                      # b|bg fused
                pl.BlockSpec((g_pad, g_pad), lambda i: (0, 0),
                             pipeline_mode=pl.Buffered(1)),                      # wf (epilogue only)
                pl.BlockSpec((1, g_pad), lambda i: (0, 0),
                             pipeline_mode=pl.Buffered(1)),                      # bf (epilogue only)
            ],
            out_specs=pl.BlockSpec((b_pad, g_pad), lambda i: (0, 0)),
            scratch_shapes=[
                pltpu.VMEM((b_pad, g_pad), jnp.float32),           # segment-sum accumulator
                pltpu.VMEM((b_pad, 128), jnp.float32),             # counts (narrow)
            ],
        ),
        compiler_params=pltpu.CompilerParams(
            dimension_semantics=("arbitrary",),
            vmem_limit_bytes=vmem_limit,
        ),
        cost_estimate=cost,
    )(xp, batchp, wcat, bcat, wfp, bfp)

    return out[:num_graphs, :g]


def reference_jax(x, batch, w, b, wg, bg, wf, bf, num_graphs):
    states = x @ w + b
    gates = jax.nn.softmax(x @ wg + bg, axis=1)
    gated = states * gates
    seg_sum = jax.ops.segment_sum(gated, batch, num_segments=num_graphs)
    counts = jax.ops.segment_sum(jnp.ones((x.shape[0],), jnp.float32), batch,
                                 num_segments=num_graphs)
    mean = seg_sum / jnp.maximum(counts, 1.0)[:, None]
    return mean @ wf + bf


if __name__ == "__main__":
    key = jax.random.PRNGKey(0)
    N, node_dim, graph_dim, num_graphs = 300, 48, 64, 5  # small; exercises padding + 3 node tiles

    k = jax.random.split(key, 9)
    x = jax.random.normal(k[0], (N, node_dim), dtype=jnp.float32)
    batch = jax.random.randint(k[1], (N,), 0, num_graphs, dtype=jnp.int32)

    # torch Linear-like init scale (~1/sqrt(fan_in)); weights stored as [in, out]
    s_node = 1.0 / jnp.sqrt(jnp.float32(node_dim))
    s_graph = 1.0 / jnp.sqrt(jnp.float32(graph_dim))
    w = jax.random.uniform(k[2], (node_dim, graph_dim), jnp.float32, -s_node, s_node)
    b = jax.random.uniform(k[3], (graph_dim,), jnp.float32, -s_node, s_node)
    wg = jax.random.uniform(k[4], (node_dim, graph_dim), jnp.float32, -s_node, s_node)
    bg = jax.random.uniform(k[5], (graph_dim,), jnp.float32, -s_node, s_node)
    wf = jax.random.uniform(k[6], (graph_dim, graph_dim), jnp.float32, -s_graph, s_graph)
    bf = jax.random.uniform(k[7], (graph_dim,), jnp.float32, -s_graph, s_graph)

    out = graph_aggregator(x, batch, w, b, wg, bg, wf, bf, num_graphs, tile_n=128)
    out = jax.block_until_ready(out)

    ref = reference_jax(x, batch, w, b, wg, bg, wf, bf, num_graphs)
    assert out.shape == (num_graphs, graph_dim)
    # Tolerance accounts for bf16 MXU operands (f32 accumulation) + approx reciprocal.
    assert jnp.allclose(out, ref, atol=1e-2, rtol=1e-2), "mismatch vs reference"

    print("KERNEL_OK")
</pallas_src>

<mosaic_0001>
module attributes {stable_mosaic.version = 11 : i64} {
  func.func @graph_aggregator_kernel(%arg0: i32, %arg1: memref<128x128xbf16, #tpu.memory_space<vmem>>, %arg2: memref<1x128xi32, #tpu.memory_space<vmem>>, %arg3: memref<128x256xbf16, #tpu.memory_space<vmem>>, %arg4: memref<1x256xf32, #tpu.memory_space<vmem>>, %arg5: memref<128x128xbf16, #tpu.memory_space<vmem>>, %arg6: memref<1x128xf32, #tpu.memory_space<vmem>>, %arg7: memref<8x128xf32, #tpu.memory_space<vmem>>, %arg8: memref<8x128xf32, #tpu.memory_space<vmem>>, %arg9: memref<8x128xf32, #tpu.memory_space<vmem>>) attributes {dimension_semantics = [#tpu.dimension_semantics<arbitrary>], iteration_bounds = array<i64: 3>, scalar_prefetch = 0 : i64, scratch_operands = 2 : i64, tpu.core_type = #tpu.core_type<tc>, window_params = [{transform_indices = @transform_0, window_bounds = array<i64: 128, 128>}, {transform_indices = @transform_1, window_bounds = array<i64: 1, 128>}, {pipeline_mode = #tpu.pipeline_mode<synchronous>, transform_indices = @transform_2, window_bounds = array<i64: 128, 256>}, {pipeline_mode = #tpu.pipeline_mode<synchronous>, transform_indices = @transform_3, window_bounds = array<i64: 1, 256>}, {pipeline_mode = #tpu.pipeline_mode<synchronous>, transform_indices = @transform_4, window_bounds = array<i64: 128, 128>}, {pipeline_mode = #tpu.pipeline_mode<synchronous>, transform_indices = @transform_5, window_bounds = array<i64: 1, 128>}, {pipeline_mode = #tpu.pipeline_mode<synchronous>, transform_indices = @transform_6, window_bounds = array<i64: 8, 128>}]} {
    %c0_i32 = arith.constant 0 : i32
    %0 = arith.cmpi eq, %arg0, %c0_i32 : i32
    %1 = arith.extui %0 : i1 to i32
    %c0_i32_0 = arith.constant 0 : i32
    %2 = arith.cmpi ne, %1, %c0_i32_0 : i32
    scf.if %2 {
      %cst_21 = arith.constant 0.000000e+00 : f32
      %44 = vector.broadcast %cst_21 : f32 to vector<8x128xf32>
      %c0_22 = arith.constant 0 : index
      %c0_23 = arith.constant 0 : index
      %45 = vector.load %arg8[%c0_22, %c0_23] : memref<8x128xf32, #tpu.memory_space<vmem>>, vector<8x128xf32>
      tpu.vector_store %arg8[%c0_22, %c0_23], %44 {strides = array<i32>} : memref<8x128xf32, #tpu.memory_space<vmem>>, vector<8x128xf32>,
      %cst_24 = arith.constant 0.000000e+00 : f32
      %46 = vector.broadcast %cst_24 : f32 to vector<8x128xf32>
      %c0_25 = arith.constant 0 : index
      %c0_26 = arith.constant 0 : index
      %47 = vector.load %arg9[%c0_25, %c0_26] : memref<8x128xf32, #tpu.memory_space<vmem>>, vector<8x128xf32>
      tpu.vector_store %arg9[%c0_25, %c0_26], %46 {strides = array<i32>} : memref<8x128xf32, #tpu.memory_space<vmem>>, vector<8x128xf32>,
    } else {
    }
    %c0 = arith.constant 0 : index
    %c0_1 = arith.constant 0 : index
    %3 = vector.load %arg1[%c0, %c0_1] : memref<128x128xbf16, #tpu.memory_space<vmem>>, vector<128x128xbf16>
    %c0_2 = arith.constant 0 : index
    %c0_3 = arith.constant 0 : index
    %4 = vector.load %arg3[%c0_2, %c0_3] : memref<128x256xbf16, #tpu.memory_space<vmem>>, vector<128x256xbf16>
    %cst = arith.constant dense<0.000000e+00> : vector<128x256xf32>
    %5 = tpu.matmul %3, %4, %cst {dimension_numbers = #tpu.dot_dimension_numbers<[1], [0], [0], [1], [0, 0, 1, 1], [], []>} : vector<128x128xbf16>, vector<128x256xbf16>, vector<128x256xf32> -> vector<128x256xf32>
    %c0_4 = arith.constant 0 : index
    %c0_5 = arith.constant 0 : index
    %6 = vector.load %arg4[%c0_4, %c0_5] : memref<1x256xf32, #tpu.memory_space<vmem>>, vector<1x256xf32>
    %7 = vector.broadcast %6 : vector<1x256xf32> to vector<128x256xf32>
    %8 = arith.addf %5, %7 : vector<128x256xf32>
    %9 = vector.extract_strided_slice %8 {offsets = [0, 0], sizes = [128, 128], strides = [1, 1]} : vector<128x256xf32> to vector<128x128xf32>
    %10 = vector.extract_strided_slice %8 {offsets = [0, 128], sizes = [128, 128], strides = [1, 1]} : vector<128x256xf32> to vector<128x128xf32>
    %cst_6 = arith.constant dense<0xFF800000> : vector<128xf32>
    %11 = vector.multi_reduction <maximumf>, %10, %cst_6 [1] : vector<128x128xf32> to vector<128xf32>
    %12 = vector.shape_cast %11 : vector<128xf32> to vector<128x1xf32>
    %13 = vector.broadcast %12 : vector<128x1xf32> to vector<128x128xf32>
    %14 = arith.subf %10, %13 : vector<128x128xf32>
    %15 = math.exp %14 : vector<128x128xf32>
    %cst_7 = arith.constant dense<0.000000e+00> : vector<128xf32>
    %16 = vector.multi_reduction <add>, %15, %cst_7 [1] : vector<128x128xf32> to vector<128xf32>
    %17 = vector.shape_cast %16 : vector<128xf32> to vector<128x1xf32>
    %18 = tpu.reciprocal %17 {approx = true} : vector<128x1xf32> -> vector<128x1xf32>
    %19 = vector.broadcast %18 : vector<128x1xf32> to vector<128x128xf32>
    %20 = arith.mulf %15, %19 : vector<128x128xf32>
    %21 = arith.mulf %9, %20 : vector<128x128xf32>
    %22 = arith.truncf %21 : vector<128x128xf32> to vector<128x128xbf16>
    %23 = tpu.iota {dimensions = array<i32: 0>} : vector<8x128xi32>
    %c0_8 = arith.constant 0 : index
    %c0_9 = arith.constant 0 : index
    %24 = vector.load %arg2[%c0_8, %c0_9] : memref<1x128xi32, #tpu.memory_space<vmem>>, vector<1x128xi32>
    %25 = vector.broadcast %24 : vector<1x128xi32> to vector<8x128xi32>
    %26 = arith.cmpi eq, %23, %25 : vector<8x128xi32>
    %27 = arith.extui %26 : vector<8x128xi1> to vector<8x128xi32>
    %28 = arith.sitofp %27 : vector<8x128xi32> to vector<8x128xf32>
    %29 = arith.truncf %28 : vector<8x128xf32> to vector<8x128xbf16>
    %c0_10 = arith.constant 0 : index
    %c0_11 = arith.constant 0 : index
    %30 = vector.load %arg8[%c0_10, %c0_11] : memref<8x128xf32, #tpu.memory_space<vmem>>, vector<8x128xf32>
    %cst_12 = arith.constant dense<0.000000e+00> : vector<8x128xf32>
    %31 = tpu.matmul %29, %22, %cst_12 {dimension_numbers = #tpu.dot_dimension_numbers<[1], [0], [0], [1], [0, 0, 1, 1], [], []>} : vector<8x128xbf16>, vector<128x128xbf16>, vector<8x128xf32> -> vector<8x128xf32>
    %32 = arith.addf %30, %31 : vector<8x128xf32>
    %c0_13 = arith.constant 0 : index
    %c0_14 = arith.constant 0 : index
    %33 = vector.load %arg8[%c0_13, %c0_14] : memref<8x128xf32, #tpu.memory_space<vmem>>, vector<8x128xf32>
    tpu.vector_store %arg8[%c0_13, %c0_14], %32 {strides = array<i32>} : memref<8x128xf32, #tpu.memory_space<vmem>>, vector<8x128xf32>,
    %c0_15 = arith.constant 0 : index
    %c0_16 = arith.constant 0 : index
    %34 = vector.load %arg9[%c0_15, %c0_16] : memref<8x128xf32, #tpu.memory_space<vmem>>, vector<8x128xf32>
    %35 = arith.extf %29 : vector<8x128xbf16> to vector<8x128xf32>
    %cst_17 = arith.constant dense<0.000000e+00> : vector<8xf32>
    %36 = vector.multi_reduction <add>, %35, %cst_17 [1] : vector<8x128xf32> to vector<8xf32>
    %37 = vector.shape_cast %36 : vector<8xf32> to vector<8x1xf32>
    %38 = vector.broadcast %37 : vector<8x1xf32> to vector<8x128xf32>
    %39 = arith.addf %34, %38 : vector<8x128xf32>
    %c0_18 = arith.constant 0 : index
    %c0_19 = arith.constant 0 : index
    %40 = vector.load %arg9[%c0_18, %c0_19] : memref<8x128xf32, #tpu.memory_space<vmem>>, vector<8x128xf32>
    tpu.vector_store %arg9[%c0_18, %c0_19], %39 {strides = array<i32>} : memref<8x128xf32, #tpu.memory_space<vmem>>, vector<8x128xf32>,
    %c2_i32 = arith.constant 2 : i32
    %41 = arith.cmpi eq, %arg0, %c2_i32 : i32
    %42 = arith.extui %41 : i1 to i32
    %c0_i32_20 = arith.constant 0 : i32
    %43 = arith.cmpi ne, %42, %c0_i32_20 : i32
    scf.if %43 {
      %c0_21 = arith.constant 0 : index
      %c0_22 = arith.constant 0 : index
      %44 = vector.load %arg9[%c0_21, %c0_22] : memref<8x128xf32, #tpu.memory_space<vmem>>, vector<8x128xf32>
      %45 = vector.extract_strided_slice %44 {offsets = [0, 0], sizes = [8, 1], strides = [1, 1]} : vector<8x128xf32> to vector<8x1xf32>
      %c0_23 = arith.constant 0 : index
      %c0_24 = arith.constant 0 : index
      %46 = vector.load %arg8[%c0_23, %c0_24] : memref<8x128xf32, #tpu.memory_space<vmem>>, vector<8x128xf32>
      %cst_25 = arith.constant 1.000000e+00 : f32
      %47 = vector.broadcast %cst_25 : f32 to vector<8x1xf32>
      %48 = arith.maximumf %45, %47 : vector<8x1xf32>
      %49 = vector.broadcast %48 : vector<8x1xf32> to vector<8x128xf32>
      %50 = arith.divf %46, %49 : vector<8x128xf32>
      %51 = arith.truncf %50 : vector<8x128xf32> to vector<8x128xbf16>
      %c0_26 = arith.constant 0 : index
      %c0_27 = arith.constant 0 : index
      %52 = vector.load %arg5[%c0_26, %c0_27] : memref<128x128xbf16, #tpu.memory_space<vmem>>, vector<128x128xbf16>
      %cst_28 = arith.constant dense<0.000000e+00> : vector<8x128xf32>
      %53 = tpu.matmul %51, %52, %cst_28 {dimension_numbers = #tpu.dot_dimension_numbers<[1], [0], [0], [1], [0, 0, 1, 1], [], []>} : vector<8x128xbf16>, vector<128x128xbf16>, vector<8x128xf32> -> vector<8x128xf32>
      %c0_29 = arith.constant 0 : index
      %c0_30 = arith.constant 0 : index
      %54 = vector.load %arg6[%c0_29, %c0_30] : memref<1x128xf32, #tpu.memory_space<vmem>>, vector<1x128xf32>
      %55 = vector.broadcast %54 : vector<1x128xf32> to vector<8x128xf32>
      %56 = arith.addf %53, %55 : vector<8x128xf32>
      %c0_31 = arith.constant 0 : index
      %c0_32 = arith.constant 0 : index
      %57 = vector.load %arg7[%c0_31, %c0_32] : memref<8x128xf32, #tpu.memory_space<vmem>>, vector<8x128xf32>
      tpu.vector_store %arg7[%c0_31, %c0_32], %56 {strides = array<i32>} : memref<8x128xf32, #tpu.memory_space<vmem>>, vector<8x128xf32>,
    } else {
    }
    return
  }
  func.func @transform_0(%arg0: i32) -> (i32, i32) {
    %c0_i32 = arith.constant 0 : i32
    %c0_i32_0 = arith.constant 0 : i32
    return %arg0, %c0_i32 : i32, i32
  }
  func.func @transform_1(%arg0: i32) -> (i32, i32) {
    %c0_i32 = arith.constant 0 : i32
    %c0_i32_0 = arith.constant 0 : i32
    return %c0_i32, %arg0 : i32, i32
  }
  func.func @transform_2(%arg0: i32) -> (i32, i32) {
    %c0_i32 = arith.constant 0 : i32
    %c0_i32_0 = arith.constant 0 : i32
    %c0_i32_1 = arith.constant 0 : i32
    return %c0_i32, %c0_i32_0 : i32, i32
  }
  func.func @transform_3(%arg0: i32) -> (i32, i32) {
    %c0_i32 = arith.constant 0 : i32
    %c0_i32_0 = arith.constant 0 : i32
    %c0_i32_1 = arith.constant 0 : i32
    return %c0_i32, %c0_i32_0 : i32, i32
  }
  func.func @transform_4(%arg0: i32) -> (i32, i32) {
    %c0_i32 = arith.constant 0 : i32
    %c0_i32_0 = arith.constant 0 : i32
    %c0_i32_1 = arith.constant 0 : i32
    return %c0_i32, %c0_i32_0 : i32, i32
  }
  func.func @transform_5(%arg0: i32) -> (i32, i32) {
    %c0_i32 = arith.constant 0 : i32
    %c0_i32_0 = arith.constant 0 : i32
    %c0_i32_1 = arith.constant 0 : i32
    return %c0_i32, %c0_i32_0 : i32, i32
  }
  func.func @transform_6(%arg0: i32) -> (i32, i32) {
    %c0_i32 = arith.constant 0 : i32
    %c0_i32_0 = arith.constant 0 : i32
    %c0_i32_1 = arith.constant 0 : i32
    return %c0_i32, %c0_i32_0 : i32, i32
  }
}

</mosaic_0001>

<bundles_post_ra>
// kernel: graph_aggregator.1
= control target key start
LH: loop header
LB: loop body
LE: loop exit
PB: predicated region body
PF: predicated region fallthrough
CT: control target
= control target key end

     0   :  { %11 = vsyncpa [#allocation5], 0  ;;  %s1273_s21 = smov 0   ;;  %s1587_s0 = inlined_call_operand.vmem [shape: bf16[384,128], index: 0, kind: input, shape index: {}]   ;;  %s1588_s1 = inlined_call_operand.vmem [shape: s32[1,384], index: 1, kind: input, shape index: {}]   ;;  %s1589_s2 = inlined_call_operand.vmem [shape: bf16[128,256], index: 2, kind: input, shape index: {}]   ;;  %s1590_s3 = inlined_call_operand.vmem [shape: f32[1,256], index: 3, kind: input, shape index: {}]   ;;  %s1591_s4 = inlined_call_operand.vmem [shape: bf16[128,128], index: 4, kind: input, shape index: {}]   ;;  %s1592_s5 = inlined_call_operand.vmem [shape: f32[1,128], index: 5, kind: input, shape index: {}]   ;;  %s1593_s6 = inlined_call_operand.hbm [shape: f32[8,128], index: 6, kind: output, shape index: {}]  }
   0x1 LB: > { %s1279_s22 = sadd.s32 4294967295, %s1227_s21   ;;  %p959_p0 = scmp.ge.s32.totalorder %s1227_s21, 1  ;;  %s1227_s21 = sphi %s1273_s21, %s17_s21  }
   0x2   : > { %p217_p1 = scmp.lt.s32.totalorder %s1227_s21, 4 }
   0x4   : > { %p218_p2 = pnand %p959_p0, %p217_p1 }
   0x5   : > { %s960_s23 = sshll.u32 (!%p218_p2), %s1279_s22, 4  ;;  %p251_p3 = scmp.lt.s32.totalorder (!%p218_p2), %s1279_s22, 2 }
   0x6   : > { %221 = sbr.rel (%p218_p2) target bundleno = 1212 (0x4bc), region = 44  ;;  %p246_p4 = scmp.lt.s32.totalorder (!%p218_p2), %s960_s23, 47 }
   0x7   : > { %p962_p5 = scmp.ne.s32.totalorder (!%p218_p2), %s1279_s22, 0 }
   0xb   : > { %s1286_s24 = scalar_select %p251_p3, %s1279_s22, 2 }
   0xc   : > { %s1595_s23 = smov (!%p246_p4, %s960_s23), 47  ;;  %258 = sbr.rel (%p962_p5) target bundleno = 19 (0x13), region = 48 }
   0xd   : > { %s253_s27 = scalar_lea.vmem %s1588_s1, %s1286_s24  ;;  %s961_s28 = sshll.u32 %s1595_s23, 2 }
   0xe   : > { %s1295_s7 = scalar_lea.vmem %s1587_s0, %s961_s28 }
  0x11   : > { %v1229_v0 = vmov 0.0  }
  0x12   : > { %259 = vst [vmem:[#allocation2] sm:$0xff] %v1229_v0  ;;  %260 = vst [vmem:[#allocation3] sm:$0xff] %v1229_v0 }
  0x13 PF: > { %v1086_v1 = vld [vmem:[%s1589_s2 + $0x74] ss:$8 sps:$4 sm:$0xff]   ;;  %v1088_v2 = vld [vmem:[%s1589_s2 + $0x70] ss:$8 sps:$4 sm:$0xff]   ;;  %v1230_v3 = vmov 0   ;;  %v1110_v18 = vld [vmem:[%s1295_s7] sm:$0xff]   ;;  %v295_v46 = vlaneseq }
  0x14   : > { %465 = vmatprep.mubr.bf16.mxu0 %v1230_v3  ;;  %433 = vmatprep.subr.bf16.mxu0 %v1086_v1  ;;  %v1089_v4 = vld [vmem:[%s1589_s2 + $0x64] ss:$8 sps:$4 sm:$0xff]   ;;  %v1091_v5 = vld [vmem:[%s1589_s2 + $0x60] ss:$8 sps:$4 sm:$0xff]   ;;  %v1092_v6 = vld [vmem:[%s1589_s2 + $0x54] ss:$8 sps:$4 sm:$0xff]  }
  0x15   : > { %434 = vmatpush1.bf16.msra.mxu0 %v1088_v2  ;;  %v1094_v7 = vld [vmem:[%s1589_s2 + $0x50] ss:$8 sps:$4 sm:$0xff]   ;;  %v1095_v8 = vld [vmem:[%s1589_s2 + $0x44] ss:$8 sps:$4 sm:$0xff]   ;;  %v1097_v9 = vld [vmem:[%s1589_s2 + $0x40] ss:$8 sps:$4 sm:$0xff]  }
  0x16   : > { %435 = vmatprep.subr.bf16.mxu0 %v1089_v4  ;;  %v1098_v10 = vld [vmem:[%s1589_s2 + $0x34] ss:$8 sps:$4 sm:$0xff]   ;;  %v1100_v11 = vld [vmem:[%s1589_s2 + $0x30] ss:$8 sps:$4 sm:$0xff]   ;;  %v1101_v12 = vld [vmem:[%s1589_s2 + $0x24] ss:$8 sps:$4 sm:$0xff]  }
  0x17   : > { %v1103_v13 = vld [vmem:[%s1589_s2 + $0x20] ss:$8 sps:$4 sm:$0xff]   ;;  %v1104_v14 = vld [vmem:[%s1589_s2 + $0x14] ss:$8 sps:$4 sm:$0xff]   ;;  %v1106_v15 = vld [vmem:[%s1589_s2 + $0x10] ss:$8 sps:$4 sm:$0xff]  }
  0x18   : > { %v1107_v16 = vld [vmem:[%s1589_s2 + $0x4] ss:$8 sps:$4 sm:$0xff]   ;;  %v1109_v17 = vld [vmem:[%s1589_s2] ss:$8 sps:$4 sm:$0xff]   ;;  %v1112_v20 = vld [vmem:[%s1295_s7 + $0x10] sm:$0xff]   ;;  %v1378_v49 = vshrl.u32 %v295_v46, 7 }
  0x19   : > { %436 = vmatpush1.bf16.msra.mxu0 %v1091_v5  ;;  %v1111_v19 = vld [vmem:[%s1295_s7 + $0x8] sm:$0xff]   ;;  %v1113_v21 = vld [vmem:[%s1295_s7 + $0x18] sm:$0xff]   ;;  %v1114_v22 = vld [vmem:[%s1295_s7 + $0x20] sm:$0xff]   ;;  %vm1232_vm0 = vmmov 0   ;;  %p991_p6 = scmp.ne.s32.totalorder %s1279_s22, 2 }
  0x1a   : > { %437 = vmatprep.subr.bf16.mxu0 %v1092_v6  ;;  %v1115_v23 = vld [vmem:[%s1295_s7 + $0x28] sm:$0xff]   ;;  %v1116_v24 = vld [vmem:[%s1295_s7 + $0x30] sm:$0xff]   ;;  %v1117_v25 = vld [vmem:[%s1295_s7 + $0x38] sm:$0xff]   ;;  %v301_v51 = vsub.s32 1, %v1378_v49 }
  0x1b   : > { %v1386_v53 = vld [vmem:[%s1590_s3] sm:$0x3] }
  0x1c   : > { %v302_v55 = vrot.slane %v1386_v53, %v301_v51 }
  0x1d   : > { %438 = vmatpush1.bf16.msra.mxu0 %v1094_v7 }
  0x1e   : > { %439 = vmatprep.subr.bf16.mxu0 %v1095_v8 }
  0x21   : > { %440 = vmatpush1.bf16.msra.mxu0 %v1097_v9 }
  0x22   : > { %441 = vmatprep.subr.bf16.mxu0 %v1098_v10 }
  0x25   : > { %442 = vmatpush1.bf16.msra.mxu0 %v1100_v11 }
  0x26   : > { %443 = vmatprep.subr.bf16.mxu0 %v1101_v12 }
  0x29   : > { %444 = vmatpush1.bf16.msra.mxu0 %v1103_v13 }
  0x2a   : > { %445 = vmatprep.subr.bf16.mxu0 %v1104_v14 }
  0x2d   : > { %446 = vmatpush1.bf16.msra.mxu0 %v1106_v15 }
  0x2e   : > { %447 = vmatprep.subr.bf16.mxu0 %v1107_v16 }
  0x31   : > { %448 = vmatpush1.bf16.msra.mxu0 %v1109_v17 }
  0x34   : > { %466 = vmatmul.mubr.bf16.vlgmr.msra.gmra.mxu0 %v1110_v18 }
  0x35   : > { %475 = vmatprep.mubr.bf16.mxu0 %v1230_v3 }
  0x3c   : > { %476 = vmatmul.mubr.bf16.gmra.mxu0 %v1111_v19 }
  0x3d   : > { %485 = vmatprep.mubr.bf16.mxu0 %v1230_v3 }
  0x44   : > { %486 = vmatmul.mubr.bf16.gmra.mxu0 %v1112_v20 }
  0x45   : > { %495 = vmatprep.mubr.bf16.mxu0 %v1230_v3 }
  0x4c   : > { %496 = vmatmul.mubr.bf16.gmra.mxu0 %v1113_v21 }
  0x4d   : > { %505 = vmatprep.mubr.bf16.mxu0 %v1230_v3 }
  0x54   : > { %506 = vmatmul.mubr.bf16.gmra.mxu0 %v1114_v22 }
  0x55   : > { %515 = vmatprep.mubr.bf16.mxu0 %v1230_v3 }
  0x5c   : > { %516 = vmatmul.mubr.bf16.gmra.mxu0 %v1115_v23 }
  0x5d   : > { %525 = vmatprep.mubr.bf16.mxu0 %v1230_v3 }
  0x64   : > { %526 = vmatmul.mubr.bf16.gmra.mxu0 %v1116_v24 }
  0x65   : > { %535 = vmatprep.mubr.bf16.mxu0 %v1230_v3 }
  0x6c   : > { %536 = vmatmul.mubr.bf16.gmra.mxu0 %v1117_v25 }
  0xf4   : > { %v1354_v26 = vpop.f32.mrf.mxu0 }
  0xf6   : > { %v1356_v27 = vpop.f32.mrf.mxu0 }
  0xf7   : > { %v1410_v14 = vadd.f32 %v1356_v27, %v302_v55 }
  0xf8   : > { %v1358_v28 = vpop.f32.mrf.mxu0 }
  0xfa   : > { %v473_v29 = vpop.f32.mrf.mxu0 }
  0xfb   : > { %v1403_v11 = vadd.f32 %v473_v29, %v302_v55 }
  0xfc   : > { %v1360_v30 = vpop.f32.mrf.mxu0 }
  0xfe   : > { %v479_v31 = vpop.f32.mrf.mxu0 }
  0xff   : > { %v1406_v13 = vadd.f32 %v479_v31, %v302_v55 }
 0x100   : > { %v1362_v32 = vpop.f32.mrf.mxu0 }
 0x102   : > { %v483_v33 = vpop.f32.mrf.mxu0 }
 0x103   : > { %v1400_v9 = vadd.f32 %v483_v33, %v302_v55 }
 0x104   : > { %v1364_v34 = vpop.f32.mrf.mxu0 }
 0x106   : > { %v489_v35 = vpop.f32.mrf.mxu0 }
 0x107   : > { %v490_v12 = vadd.f32 %v489_v35, %v302_v55 }
 0x108   : > { %v1366_v36 = vpop.f32.mrf.mxu0 }
 0x10a   : > { %v493_v37 = vpop.f32.mrf.mxu0 }
 0x10b   : > { %v1397_v7 = vadd.f32 %v493_v37, %v302_v55 }
 0x10c   : > { %v1368_v38 = vpop.f32.mrf.mxu0 }
 0x10e   : > { %v499_v39 = vpop.f32.mrf.mxu0 }
 0x10f   : > { %v500_v10 = vadd.f32 %v499_v39, %v302_v55 }
 0x110   : > { %v1370_v40 = vpop.f32.mrf.mxu0 }
 0x112   : > { %v503_v41 = vpop.f32.mrf.mxu0 }
 0x113   : > { %v504_v5 = vadd.f32 %v503_v41, %v302_v55 }
 0x114   : > { %v1372_v42 = vpop.f32.mrf.mxu0 }
 0x116   : > { %v509_v43 = vpop.f32.mrf.mxu0 }
 0x117   : > { %v510_v8 = vadd.f32 %v509_v43, %v302_v55 }
 0x118   : > { %v1374_v44 = vpop.f32.mrf.mxu0 }
 0x11a   : > { %v513_v45 = vpop.f32.mrf.mxu0 }
 0x11b   : > { %v514_v3 = vadd.f32 %v513_v45, %v302_v55 }
 0x11c   : > { %v1376_v47 = vpop.f32.mrf.mxu0 }
 0x11e   : > { %v519_v48 = vpop.f32.mrf.mxu0 }
 0x11f   : > { %v520_v6 = vadd.f32 %v519_v48, %v302_v55 }
 0x120   : > { %v1380_v50 = vpop.f32.mrf.mxu0 }
 0x122   : > { %v523_v52 = vpop.f32.mrf.mxu0 }
 0x123   : > { %v524_v63 = vadd.f32 %v523_v52, %v302_v55 }
 0x124   : > { %v1388_v54 = vpop.f32.mrf.mxu0 }
 0x126   : > { %v529_v56 = vpop.f32.mrf.mxu0 }
 0x127   : > { %v530_v57 = vadd.f32 %v529_v56, %v302_v55 }
 0x128   : > { %v1391_v58 = vpop.f32.mrf.mxu0 }
 0x129   : > { %570 = vmax.xlane.f32.xlu1 %v530_v57 }
 0x12a   : > { %v533_v59 = vpop.f32.mrf.mxu0 }
 0x12b   : > { %v534_v60 = vadd.f32 %v533_v59, %v302_v55 }
 0x12c   : > { %v1393_v61 = vpop.f32.mrf.mxu0 }
 0x12d   : > { %572 = vmax.xlane.f32.xlu1 %v534_v60 }
 0x12e   : > { %v539_v62 = vpop.f32.mrf.mxu0 }
 0x12f   : > { %v540_v0 = vadd.f32 %v539_v62, %v302_v55 }
 0x130   : > { %v1395_v1 = vpop.f32.mrf.mxu0 }
 0x131   : > { %574 = vmax.xlane.f32.xlu0 %v540_v0  ;;  %568 = vmax.xlane.f32.xlu1 %v524_v63 }
 0x132   : > { %v543_v2 = vpop.f32.mrf.mxu0 }
 0x133   : > { %v544_v4 = vadd.f32 %v543_v2, %v302_v55 }
 0x135   : > { %576 = vmax.xlane.f32.xlu0 %v544_v4  ;;  %564 = vmax.xlane.f32.xlu1 %v514_v3 }
 0x139   : > { %566 = vmax.xlane.f32.xlu0 %v520_v6  ;;  %560 = vmax.xlane.f32.xlu1 %v504_v5 }
 0x13d   : > { %562 = vmax.xlane.f32.xlu0 %v510_v8  ;;  %556 = vmax.xlane.f32.xlu1 %v1397_v7 }
 0x141   : > { %558 = vmax.xlane.f32.xlu0 %v500_v10  ;;  %552 = vmax.xlane.f32.xlu1 %v1400_v9 }
 0x145   : > { %554 = vmax.xlane.f32.xlu0 %v490_v12  ;;  %548 = vmax.xlane.f32.xlu1 %v1403_v11 }
 0x149   : > { %550 = vmax.xlane.f32.xlu0 %v1406_v13 }
 0x14d   : > { %546 = vmax.xlane.f32.xlu0 %v1410_v14 }
 0x1b2   : > { %v571_v15 = vpop.xlane.xlu1 %570 }
 0x1b3   : > { %v590_v17 = vsub.f32 %v530_v57, %v571_v15 }
 0x1b5   : > { %v618_v22 = vmul.f32 1.442695, %v590_v17 }
 0x1b6   : > { %v573_v16 = vpop.xlane.xlu1 %572 }
 0x1b7   : > { %v591_v23 = vsub.f32 %v534_v60, %v573_v16 }
 0x1b9   : > { %v620_v33 = vmul.f32 1.442695, %v591_v23 }
 0x1ba   : > { %v575_v18 = vpop.xlane.xlu0 %574  ;;  %v569_v19 = vpop.xlane.xlu1 %568 }
 0x1bb   : > { %v592_v20 = vsub.f32 %v540_v0, %v575_v18  ;;  %v589_v27 = vsub.f32 %v524_v63, %v569_v19 }
 0x1bd   : > { %v622_v21 = vmul.f32 1.442695, %v592_v20  ;;  %v616_v43 = vmul.f32 1.442695, %v589_v27 }
 0x1be   : > { %v577_v24 = vpop.xlane.xlu0 %576  ;;  %v565_v25 = vpop.xlane.xlu1 %564 }
 0x1bf   : > { %1118 = vpow2.f32 %v622_v21  ;;  %v593_v29 = vsub.f32 %v544_v4, %v577_v24  ;;  %v587_v45 = vsub.f32 %v514_v3, %v565_v25 }
 0x1c0   : > { %1120 = vpow2.f32 %v618_v22 }
 0x1c1   : > { %v624_v31 = vmul.f32 1.442695, %v593_v29  ;;  %v612_v55 = vmul.f32 1.442695, %v587_v45 }
 0x1c2   : > { %v567_v35 = vpop.xlane.xlu0 %566  ;;  %v561_v37 = vpop.xlane.xlu1 %560 }
 0x1c3   : > { %1122 = vpow2.f32 %v624_v31  ;;  %v588_v39 = vsub.f32 %v520_v6, %v567_v35  ;;  %v585_v56 = vsub.f32 %v504_v5, %v561_v37 }
 0x1c4   : > { %1124 = vpow2.f32 %v620_v33 }
 0x1c5   : > { %v614_v41 = vmul.f32 1.442695, %v588_v39  ;;  %v608_v63 = vmul.f32 1.442695, %v585_v56 }
 0x1c6   : > { %v563_v46 = vpop.xlane.xlu0 %562  ;;  %v557_v51 = vpop.xlane.xlu1 %556 }
 0x1c7   : > { %1126 = vpow2.f32 %v614_v41  ;;  %v586_v48 = vsub.f32 %v510_v8, %v563_v46  ;;  %v583_v0 = vsub.f32 %v1397_v7, %v557_v51  ;;  %v1231_v41 = vmov 0.0  }
 0x1c8   : > { %1128 = vpow2.f32 %v616_v43  ;;  %1023 = vmatprep.subr.bf16.mxu1 %v1231_v41  ;;  %v1472_v43 = vld [vmem:[%s253_s27] ss:$0 sm:$0xff]  ;;  %1039 = vmatprep.mubr.msk.bf16.mxu1 %vm1232_vm0, %v1231_v41 }
 0x1c9   : > { %v610_v52 = vmul.f32 1.442695, %v586_v48  ;;  %vm721_vm1 = vcmp.eq.s32.totalorder %v1378_v49, %v1472_v43 }
 0x1ca   : > { %v559_v57 = vpop.xlane.xlu0 %558  ;;  %v553_v2 = vpop.xlane.xlu1 %552  ;;  %v988_v45 = vsel %vm721_vm1, 1.0, %v1231_v41  ;;  %vm989_vm2 = vmpackc.low %vm721_vm1, %vm721_vm1 }
 0x1cb   : > { %1130 = vpow2.f32 %v610_v52  ;;  %v584_v59 = vsub.f32 %v500_v10, %v559_v57  ;;  %v604_v10 = vmul.f32 1.442695, %v583_v0  ;;  %v581_v15 = vsub.f32 %v1400_v9, %v553_v2 }
 0x1cc   : > { %v1413_v60 = vpop.eup %1118  ;;  %1132 = vpow2.f32 %v612_v55 }
 0x1cd   : > { %v606_v62 = vmul.f32 1.442695, %v584_v59  ;;  %654 = vadd.xlane.f32.xlu0 %v1413_v60  ;;  %v1417_v4 = vpop.eup %1120  ;;  %v600_v20 = vmul.f32 1.442695, %v581_v15  ;;  %v297_v59 = vsub.s32 0, %v1378_v49 }
 0x1ce   : > { %v555_v3 = vpop.xlane.xlu0 %554 }
 0x1cf   : > { %1134 = vpow2.f32 %v606_v62  ;;  %v582_v6 = vsub.f32 %v490_v12, %v555_v3  ;;  %v549_v12 = vpop.xlane.xlu1 %548  ;;  %v1483_v2 = vrot.slane %v1386_v53, %v297_v59 }
 0x1d0   : > { %v1419_v8 = vpop.eup %1122  ;;  %1136 = vpow2.f32 %v608_v63  ;;  %v579_v9 = vsub.f32 %v1403_v11, %v549_v12 }
 0x1d1   : > { %v602_v5 = vmul.f32 1.442695, %v582_v6  ;;  %656 = vadd.xlane.f32.xlu1 %v1419_v8  ;;  %650 = vadd.xlane.f32.xlu0 %v1417_v4  ;;  %v1424_v17 = vpop.eup %1124  ;;  %v542_v15 = vadd.f32 %v1395_v1, %v1483_v2 }
 0x1d2   : > { %v551_v16 = vpop.xlane.xlu0 %550  ;;  %v596_v29 = vmul.f32 1.442695, %v579_v9  ;;  %v528_v9 = vadd.f32 %v1388_v54, %v1483_v2  ;;  %v518_v54 = vadd.f32 %v1376_v47, %v1483_v2  ;;  %v508_v47 = vadd.f32 %v1372_v42, %v1483_v2 }
 0x1d3   : > { %1138 = vpow2.f32 %v602_v5  ;;  %v580_v7 = vsub.f32 %v1406_v13, %v551_v16  ;;  %v498_v42 = vadd.f32 %v1368_v38, %v1483_v2  ;;  %v492_v38 = vadd.f32 %v1366_v36, %v1483_v2 }
 0x1d4   : > { %v1427_v18 = vpop.eup %1126  ;;  %1140 = vpow2.f32 %v604_v10  ;;  %v538_v10 = vadd.f32 %v1393_v61, %v1483_v2  ;;  %v532_v61 = vadd.f32 %v1391_v58, %v1483_v2  ;;  %v522_v58 = vadd.f32 %v1380_v50, %v1483_v2 }
 0x1d5   : > { %v598_v19 = vmul.f32 1.442695, %v580_v7  ;;  %652 = vadd.xlane.f32.xlu1 %v1424_v17  ;;  %646 = vadd.xlane.f32.xlu0 %v1427_v18  ;;  %v1431_v22 = vpop.eup %1128  ;;  %v512_v50 = vadd.f32 %v1374_v44, %v1483_v2  ;;  %v502_v44 = vadd.f32 %v1370_v40, %v1483_v2 }
 0x1d6   : > { %v547_v21 = vpop.xlane.xlu0 %546 }
 0x1d7   : > { %1142 = vpow2.f32 %v598_v19  ;;  %v578_v23 = vsub.f32 %v1410_v14, %v547_v21 }
 0x1d8   : > { %v1435_v24 = vpop.eup %1130  ;;  %1144 = vpow2.f32 %v600_v20 }
 0x1d9   : > { %v594_v13 = vmul.f32 1.442695, %v578_v23  ;;  %648 = vadd.xlane.f32.xlu1 %v1431_v22  ;;  %642 = vadd.xlane.f32.xlu0 %v1435_v24  ;;  %v1439_v25 = vpop.eup %1132 }
 0x1db   : > { %1146 = vpow2.f32 %v594_v13 }
 0x1dc   : > { %v1441_v31 = vpop.eup %1134  ;;  %1148 = vpow2.f32 %v596_v29 }
 0x1dd   : > { %644 = vadd.xlane.f32.xlu1 %v1439_v25  ;;  %638 = vadd.xlane.f32.xlu0 %v1441_v31  ;;  %v1445_v11 = vpop.eup %1136 }
 0x1e0   : > { %v1447_v14 = vpop.eup %1138 }
 0x1e1   : > { %640 = vadd.xlane.f32.xlu1 %v1445_v11  ;;  %634 = vadd.xlane.f32.xlu0 %v1447_v14  ;;  %v1451_v33 = vpop.eup %1140 }
 0x1e4   : > { %v1453_v27 = vpop.eup %1142 }
 0x1e5   : > { %636 = vadd.xlane.f32.xlu1 %v1451_v33  ;;  %630 = vadd.xlane.f32.xlu0 %v1453_v27  ;;  %v1457_v35 = vpop.eup %1144 }
 0x1e8   : > { %v1459_v37 = vpop.eup %1146 }
 0x1e9   : > { %632 = vadd.xlane.f32.xlu1 %v1457_v35  ;;  %626 = vadd.xlane.f32.xlu0 %v1459_v37  ;;  %v1463_v39 = vpop.eup %1148 }
 0x1ed   : > { %628 = vadd.xlane.f32.xlu1 %v1463_v39  ;;  %770 = vadd.xlane.f32.xlu0 %v988_v45 }
 0x256   : > { %v655_v46 = vpop.xlane.xlu0 %654 }
 0x257   : > { %1150 = vrcp.f32 %v655_v46 }
 0x25a   : > { %v657_v48 = vpop.xlane.xlu1 %656  ;;  %v651_v51 = vpop.xlane.xlu0 %650 }
 0x25b   : > { %1152 = vrcp.f32 %v657_v48 }
 0x25c   : > { %1154 = vrcp.f32 %v651_v51 }
 0x25e   : > { %v653_v52 = vpop.xlane.xlu1 %652  ;;  %v647_v55 = vpop.xlane.xlu0 %646 }
 0x25f   : > { %1156 = vrcp.f32 %v653_v52 }
 0x260   : > { %1158 = vrcp.f32 %v647_v55 }
 0x262   : > { %v649_v56 = vpop.xlane.xlu1 %648  ;;  %v643_v57 = vpop.xlane.xlu0 %642 }
 0x263   : > { %1160 = vrcp.f32 %v649_v56 }
 0x264   : > { %v1151_v62 = vpop.eup %1150  ;;  %1162 = vrcp.f32 %v643_v57 }
 0x265   : > { %v688_v3 = vmul.f32 %v1151_v62, %v1413_v60 }
 0x266   : > { %v645_v63 = vpop.xlane.xlu1 %644  ;;  %v639_v0 = vpop.xlane.xlu0 %638 }
 0x267   : > { %1164 = vrcp.f32 %v645_v63  ;;  %v704_v19 = vmul.f32 %v688_v3, %v538_v10 }
 0x268   : > { %v1153_v6 = vpop.eup %1152  ;;  %1166 = vrcp.f32 %v639_v0 }
 0x269   : > { %v1155_v5 = vpop.eup %1154  ;;  %v689_v16 = vmul.f32 %v1153_v6, %v1419_v8 }
 0x26a   : > { %v641_v7 = vpop.xlane.xlu1 %640  ;;  %v635_v12 = vpop.xlane.xlu0 %634  ;;  %v686_v20 = vmul.f32 %v1155_v5, %v1417_v4 }
 0x26b   : > { %1168 = vrcp.f32 %v641_v7  ;;  %v705_v53 = vmul.f32 %v689_v16, %v542_v15 }
 0x26c   : > { %v1157_v21 = vpop.eup %1156  ;;  %1170 = vrcp.f32 %v635_v12  ;;  %v702_v29 = vmul.f32 %v686_v20, %v528_v9 }
 0x26d   : > { %v1159_v60 = vpop.eup %1158  ;;  %v713_v23 = vpack.c.bf16 %v705_v53, %v704_v19  ;;  %v687_v1 = vmul.f32 %v1157_v21, %v1424_v17  ;;  %v488_v53 = vadd.f32 %v1364_v34, %v1483_v2  ;;  %v482_v34 = vadd.f32 %v1362_v32, %v1483_v2 }
 0x26e   : > { %v637_v8 = vpop.xlane.xlu1 %636  ;;  %v631_v13 = vpop.xlane.xlu0 %630  ;;  %v684_v4 = vmul.f32 %v1159_v60, %v1427_v18 }
 0x26f   : > { %1172 = vrcp.f32 %v637_v8  ;;  %1024 = vmatpush3.bf16.msra.mxu1 %v713_v23  ;;  %v703_v45 = vmul.f32 %v687_v1, %v532_v61  ;;  %v478_v61 = vadd.f32 %v1360_v30, %v1483_v2  ;;  %v472_v30 = vadd.f32 %v1358_v28, %v1483_v2 }
 0x270   : > { %v1161_v46 = vpop.eup %1160  ;;  %1174 = vrcp.f32 %v631_v13  ;;  %1025 = vmatprep.subr.bf16.mxu1 %v1231_v41  ;;  %v700_v56 = vmul.f32 %v684_v4, %v518_v54 }
 0x271   : > { %v1163_v48 = vpop.eup %1162  ;;  %v712_v17 = vpack.c.bf16 %v703_v45, %v702_v29  ;;  %v685_v51 = vmul.f32 %v1161_v46, %v1431_v22 }
 0x272   : > { %v633_v52 = vpop.xlane.xlu1 %632  ;;  %v627_v55 = vpop.xlane.xlu0 %626  ;;  %v682_v57 = vmul.f32 %v1163_v48, %v1435_v24 }
 0x273   : > { %1176 = vrcp.f32 %v633_v52  ;;  %1026 = vmatpush3.bf16.msra.mxu1 %v712_v17  ;;  %v701_v18 = vmul.f32 %v685_v51, %v522_v58 }
 0x274   : > { %v1165_v59 = vpop.eup %1164  ;;  %1178 = vrcp.f32 %v627_v55  ;;  %1027 = vmatprep.subr.bf16.mxu1 %v1231_v41  ;;  %v698_v3 = vmul.f32 %v682_v57, %v508_v47 }
 0x275   : > { %v1167_v62 = vpop.eup %1166  ;;  %v711_v22 = vpack.c.bf16 %v701_v18, %v700_v56  ;;  %v683_v63 = vmul.f32 %v1165_v59, %v1439_v25 }
 0x276   : > { %v629_v0 = vpop.xlane.xlu1 %628  ;;  %v680_v24 = vmul.f32 %v1167_v62, %v1441_v31  ;;  %v771_v46 = vpop.xlane.xlu0 %770 }
 0x277   : > { %1180 = vrcp.f32 %v629_v0  ;;  %1028 = vmatpush3.bf16.msra.mxu1 %v711_v22  ;;  %v699_v6 = vmul.f32 %v683_v63, %v512_v50 }
 0x278   : > { %v1169_v5 = vpop.eup %1168  ;;  %1029 = vmatprep.subr.bf16.mxu1 %v1231_v41  ;;  %v696_v16 = vmul.f32 %v680_v24, %v498_v42 }
 0x279   : > { %v1171_v10 = vpop.eup %1170  ;;  %v710_v15 = vpack.c.bf16 %v699_v6, %v698_v3  ;;  %v681_v25 = vmul.f32 %v1169_v5, %v1445_v11 }
 0x27a   : > { %v678_v12 = vmul.f32 %v1171_v10, %v1447_v14 }
 0x27b   : > { %1030 = vmatpush3.bf16.msra.mxu1 %v710_v15  ;;  %v697_v7 = vmul.f32 %v681_v25, %v502_v44 }
 0x27c   : > { %v1173_v19 = vpop.eup %1172  ;;  %1031 = vmatprep.subr.bf16.mxu1 %v1231_v41  ;;  %v694_v11 = vmul.f32 %v678_v12, %v488_v53 }
 0x27d   : > { %v1175_v31 = vpop.eup %1174  ;;  %v709_v20 = vpack.c.bf16 %v697_v7, %v696_v16  ;;  %v679_v40 = vmul.f32 %v1173_v19, %v1451_v33 }
 0x27e   : > { %v676_v60 = vmul.f32 %v1175_v31, %v1453_v27  ;;  %v468_v27 = vadd.f32 %v1354_v26, %v1483_v2  ;;  %v768_v26 = vld [vmem:[#allocation3] sm:$0xff]  ;;  %v725_v2 = vld [vmem:[#allocation2] sm:$0xff] }
 0x27f   : > { %1032 = vmatpush3.bf16.msra.mxu1 %v709_v20  ;;  %v695_v21 = vmul.f32 %v679_v40, %v492_v38  ;;  %v772_v28 = vadd.f32 %v771_v46, %v768_v26 }
 0x280   : > { %v1177_v9 = vpop.eup %1176  ;;  %1033 = vmatprep.subr.bf16.mxu1 %v1231_v41  ;;  %v692_v33 = vmul.f32 %v676_v60, %v478_v61 }
 0x281   : > { %v1179_v14 = vpop.eup %1178  ;;  %v708_v23 = vpack.c.bf16 %v695_v21, %v694_v11  ;;  %v677_v36 = vmul.f32 %v1177_v9, %v1457_v35  ;;  %773 = vst [vmem:[#allocation3] sm:$0xff] %v772_v28 }
 0x282   : > { %v674_v8 = vmul.f32 %v1179_v14, %v1459_v37  ;;  %v1233_v37 = vmov 1.0|1.0  }
 0x283   : > { %1034 = vmatpush3.bf16.msra.mxu1 %v708_v23  ;;  %v693_v1 = vmul.f32 %v677_v36, %v482_v34 }
 0x284   : > { %v1181_v13 = vpop.eup %1180  ;;  %1035 = vmatprep.subr.bf16.mxu1 %v1231_v41  ;;  %v690_v45 = vmul.f32 %v674_v8, %v468_v27 }
 0x285   : > { %v707_v29 = vpack.c.bf16 %v693_v1, %v692_v33  ;;  %v675_v32 = vmul.f32 %v1181_v13, %v1463_v39 }
 0x287   : > { %1036 = vmatpush3.bf16.msra.mxu1 %v707_v29  ;;  %v691_v35 = vmul.f32 %v675_v32, %v472_v30 }
 0x288   : > { %1037 = vmatprep.subr.bf16.mxu1 %v1231_v41 }
 0x289   : > { %v706_v4 = vpack.c.bf16 %v691_v35, %v690_v45 }
 0x28b   : > { %1038 = vmatpush3.bf16.msra.mxu1 %v706_v4 }
 0x28e   : > { %1040 = vmatmul.mubr.msk.bf16.vlgmr.msra.gmra.mxu1 %vm989_vm2, %v1233_v37 }
 0x34e   : > { %v760_v39 = vpop.f32.mrf.mxu1 }
 0x34f   : > { %v766_v48 = vadd.f32 %v760_v39, %v725_v2 }
 0x350   : > { %v1041_v54 = vpop.f32.mrf.mxu1  ;;  %777 = sbr.rel (%p991_p6) target bundleno = 1197 (0x4ad), region = 52 }
 0x351   : > { %767 = vst [vmem:[#allocation2] sm:$0xff] %v766_v48 }
 0x352   : > { %v763_v58 = vpop.f32.mrf.mxu1 }
 0x354   : > { %v1042_v41 = vpop.f32.mrf.mxu1 }
 0x355   : > { %v778_v17 = vld [vmem:[#allocation3] sm:$0xff]  ;;  %v1183_v49 = vld [vmem:[%s1591_s4 + $0x38] sm:$0xff]   ;;  %v1234_v43 = vmov 0   ;;  %v1235_v52 = vmov 0.0   ;;  %v1184_v55 = vld [vmem:[%s1591_s4 + $0x30] sm:$0xff]   ;;  %vm1236_vm3 = vmmov 0  }
 0x356   : > { %1182 = vset.pattern.permute.xlu0 %v1234_v43  ;;  %v780_v51 = vmax.f32 %v778_v17, 1.0  ;;  %1043 = vmatprep.subr.bf16.mxu0 %v1235_v52  ;;  %v1185_v56 = vld [vmem:[%s1591_s4 + $0x28] sm:$0xff]   ;;  %v1186_v18 = vld [vmem:[%s1591_s4 + $0x20] sm:$0xff]   ;;  %v1187_v57 = vld [vmem:[%s1591_s4 + $0x18] sm:$0xff]  }
 0x357   : > { %1044 = vmatpush3.bf16.msra.mxu0 %v1183_v49  ;;  %1059 = vmatprep.mubr.msk.bf16.mxu0 %vm1236_vm3, %v1235_v52  ;;  %v1188_v59 = vld [vmem:[%s1591_s4 + $0x10] sm:$0xff]   ;;  %v1189_v62 = vld [vmem:[%s1591_s4 + $0x8] sm:$0xff]   ;;  %v1190_v47 = vld [vmem:[%s1591_s4] sm:$0xff]  }
 0x358   : > { %783 = vperm.xlu0 %1182, %v780_v51   ;;  %1045 = vmatprep.subr.bf16.mxu0 %v1235_v52  ;;  %v779_v22 = vld [vmem:[#allocation2] sm:$0xff] }
 0x359   : > { %v992_v6 = vld [vmem:[%s1592_s5] ss:$0 sm:$0xff] }
 0x35b   : > { %1046 = vmatpush3.bf16.msra.mxu0 %v1184_v55 }
 0x35c   : > { %1047 = vmatprep.subr.bf16.mxu0 %v1235_v52 }
 0x35f   : > { %1048 = vmatpush3.bf16.msra.mxu0 %v1185_v56 }
 0x360   : > { %1049 = vmatprep.subr.bf16.mxu0 %v1235_v52 }
 0x363   : > { %1050 = vmatpush3.bf16.msra.mxu0 %v1186_v18 }
 0x364   : > { %1051 = vmatprep.subr.bf16.mxu0 %v1235_v52 }
 0x367   : > { %1052 = vmatpush3.bf16.msra.mxu0 %v1187_v57 }
 0x368   : > { %1053 = vmatprep.subr.bf16.mxu0 %v1235_v52 }
 0x36b   : > { %1054 = vmatpush3.bf16.msra.mxu0 %v1188_v59 }
 0x36c   : > { %1055 = vmatprep.subr.bf16.mxu0 %v1235_v52 }
 0x36f   : > { %1056 = vmatpush3.bf16.msra.mxu0 %v1189_v62 }
 0x370   : > { %1057 = vmatprep.subr.bf16.mxu0 %v1235_v52 }
 0x373   : > { %1058 = vmatpush3.bf16.msra.mxu0 %v1190_v47 }
 0x3d3   : > { %v784_v50 = vpop.permute.xlu0 %783 }
 0x3d4   : > { %1191 = vrcp.f32 %v784_v50 }
 0x3e1   : > { %v1192_v63 = vpop.eup %1191 }
 0x3e2   : > { %v787_v0 = vmul.f32 %v1192_v63, %v779_v22 }
 0x3e4   : > { %v788_v3 = vpack.c.bf16 %v787_v0, %v787_v0 }
 0x3e6   : > { %1060 = vmatmul.mubr.bf16.vlgmr.msra.gmra.mxu0 %v788_v3 }
 0x4a6   : > { %v894_v24 = vpop.f32.mrf.mxu0 }
 0x4a7   : > { %v895_v5 = vadd.f32 %v992_v6, %v894_v24 }
 0x4a8   : > { %v1061_v10 = vpop.f32.mrf.mxu0 }
 0x4a9   : > { %900 = vst [vmem:[#allocation4] sm:$0xff] %v895_v5 }
 0x4aa   : > { %v897_v42 = vpop.f32.mrf.mxu0 }
 0x4ac   : > { %v1062_v44 = vpop.f32.mrf.mxu0 }
 0x4ad PF: > { %p1067_p7 = scmp.eq.s32.totalorder %s1279_s22, 2  ;;  %s1237_s7 = smov [#allocation4]  }
 0x4ae   : > { %s908_s23 = sshll.u32 %s1237_s7, 4  ;;  %s909_s23 = int_to_ptr.vmem [resolvable:$true] %s908_s23 }
 0x4af   : > { %s1193_s25 = scalar_lea.vmem %s909_s23, 128  ;;  %p1200_p11 = scmp.lt.s32.totalorder %s909_s23, %s909_s23 }
 0x4b0   : > { %p1194_p8 = scmp.ne.s32.totalorder %s909_s23, %s1193_s25  ;;  %p1201_p12 = scmp.lt.s32.totalorder %s1193_s25, %s1193_s25 }
 0x4b2   : > { %p1195_p9 = pnand %p1194_p8, %p1067_p7  ;;  %p1202_p13 = por %p1201_p12, %p1200_p11 }
 0x4b4   : > { %p1196_p10 = pneg %p1195_p9 }
 0x4b6   : > { %p1203_p0 = pnand %p1202_p13, %p1196_p10 }
 0x4b8   : > { %1206 = shalt.err (!%p1203_p0)
}
 0x4b9   : > { %1064 = dma.vmem_to_hbm [thread:$0]  (%p1067_p7), %s909_s23, 128, %s1593_s6, [#allocation5]  }
 0x4ba   : > { %1222 = dma.done.wait (%p1067_p7), [#allocation5], 128  }
 0x4bb   : > { %1224 = vsyncadd (%p1067_p7), [#allocation5], 4294967168 }
 0x4bc PF: > { %s17_s21 = sadd.s32 1, %s1227_s21  }
 0x4bd   : > { %p14_p1 = scmp.ge.s32.totalorder %s17_s21, 5  }
 0x4bf   :  { %16 = sbr.rel (!%p14_p1) target bundleno = 1 (0x1), region = 82 }
 0x4c4   :  { %921 = vsyncpa [#allocation5], 1 }
 0x4c5   :  { %923 = vsyncpa [#allocation5 + $0x1], 1 }

</bundles_post_ra>
